<compile_context>
chip_gen: v5e
topology: v5e:2x2
jax: 0.10.0
libtpu: 0.0.40
codegen_flags: <defaults>
</compile_context>

<pallas_src>
import functools

import jax
import jax.numpy as jnp
from jax.experimental import pallas as pl
from jax.experimental.pallas import tpu as pltpu


def _round_up(v, m):
    return (v + m - 1) // m * m


def _mlp_kernel(x_ref, w_in_ref, w_out_ref, b_in_ref, b_out_ref, o_ref,
                acc_ref, *, act_type):
    j = pl.program_id(1)

    @pl.when(j == 0)
    def _():
        acc_ref[...] = jnp.zeros_like(acc_ref)

    # pre_j = x @ W_in^T[:, j-tile]  -> (tm, tn); bf16 MXU operands, f32 acc.
    x = x_ref[...].astype(jnp.bfloat16)
    pre = jnp.dot(x, w_in_ref[...], preferred_element_type=jnp.float32)
    pre = pre + b_in_ref[...]                               # (1, tn) broadcast, f32

    if act_type == "ReLU":
        post = jnp.maximum(pre, 0.0)
    elif act_type == "GeLU":
        # exact (erf) GeLU, matching torch.nn.functional.gelu default
        post = 0.5 * pre * (1.0 + jax.lax.erf(pre * jnp.float32(0.7071067811865476)))
    else:
        raise ValueError(f"Invalid act_type {act_type}")

    # acc += post_j @ W_out^T[j-tile, :]  -> (tm, d_model), f32 accumulation
    # across the d_mlp reduction grid axis.
    acc_ref[...] += jnp.dot(post.astype(jnp.bfloat16), w_out_ref[...],
                            preferred_element_type=jnp.float32)

    @pl.when(j == pl.num_programs(1) - 1)
    def _():
        o_ref[...] = (acc_ref[...] + b_out_ref[...]).astype(o_ref.dtype)


def _pick_tn(d_mlp):
    # Reduction tile must divide d_mlp exactly (a padded K-tile would corrupt
    # the reduction) and be MXU-friendly (multiple of 128 on all generations).
    for c in (512, 256, 128):
        if d_mlp % c == 0:
            return c
    return d_mlp  # odd d_mlp: keep it whole (single reduction step)


def _per_step_vmem_bytes(tm, tn, d_model, out_itemsize):
    return (2 * tm * d_model * 4            # x tile (f32 in HBM), double-buffered
            + 2 * d_model * tn * 2          # W_in^T tile (bf16), double-buffered
            + 2 * tn * d_model * 2          # W_out^T tile (bf16), double-buffered
            + 2 * tn * 4                    # b_in tile (f32), double-buffered
            + 2 * d_model * 4               # b_out (f32), double-buffered
            + 2 * tm * d_model * out_itemsize   # output tile, double-buffered
            + tm * d_model * 4              # f32 accumulator scratch
            + 2 * tm * tn * 4)              # pre/post f32 intermediates (approx)


def mlp_forward(x, w_in, w_out, b_in, b_out, *, act_type="ReLU", tm=None):
    """x: (batch, pos, d_model) -> (batch, pos, d_model)."""
    B, P, d_model = x.shape
    d_mlp = w_in.shape[0]
    M = B * P

    x2d = x.reshape(M, d_model)
    # One-time wrapper-side prep: transpose so both in-kernel matmuls are plain
    # (M,K)x(K,N) contractions, and cast weights to the MXU-native bf16.
    w_in_t = w_in.T.astype(jnp.bfloat16)        # (d_model, d_mlp)
    w_out_t = w_out.T.astype(jnp.bfloat16)      # (d_mlp, d_model)
    b_in2d = b_in.reshape(1, d_mlp).astype(jnp.float32)
    b_out2d = b_out.reshape(1, d_model).astype(jnp.float32)

    tn = _pick_tn(d_mlp)

    # Generation-aware VMEM cap (v7x: 64 MiB per TensorCore).
    try:
        vmem_cap = int(pltpu.get_tpu_info().vmem_capacity_bytes)
    except Exception:
        vmem_cap = 64 << 20

    # Row tile: multiples of 16 (bf16 sublane packing), aim for >= ~8 steps on
    # the parallel axis (feeds both v7x TensorCores), cap at 512, and shrink
    # if the per-step footprint would not fit VMEM.
    if tm is None:
        tm = min(512, max(16, _round_up(pl.cdiv(M, 8), 16)))
        tm = min(tm, _round_up(M, 16))
        while tm > 64 and _per_step_vmem_bytes(tm, tn, d_model, x.dtype.itemsize) > 0.7 * vmem_cap:
            tm //= 2

    grid = (pl.cdiv(M, tm), d_mlp // tn)

    per_step = _per_step_vmem_bytes(tm, tn, d_model, x.dtype.itemsize)
    vmem_budget = int(1.25 * per_step) + (4 << 20)
    vmem_budget = max(vmem_budget, 16 << 20)
    vmem_budget = min(vmem_budget, int(0.9 * vmem_cap))

    # Advisory cost estimate for the XLA scheduler.
    flops = 4 * M * d_mlp * d_model                 # two matmuls, 2 flops / MAC
    transcendentals = M * d_mlp if act_type == "GeLU" else 0
    bytes_accessed = (M * d_model * 4                       # x read (f32)
                      + M * d_model * x.dtype.itemsize      # out write
                      + grid[0] * 2 * d_model * d_mlp * 2   # weights streamed per row tile (bf16)
                      + b_in.size * 4 + b_out.size * 4)

    kernel = functools.partial(_mlp_kernel, act_type=act_type)

    out2d = pl.pallas_call(
        kernel,
        out_shape=jax.ShapeDtypeStruct((M, d_model), x.dtype),
        grid_spec=pltpu.PrefetchScalarGridSpec(
            num_scalar_prefetch=0,
            grid=grid,
            in_specs=[
                pl.BlockSpec((tm, d_model), lambda i, j: (i, 0)),   # x rows (resident over j)
                pl.BlockSpec((d_model, tn), lambda i, j: (0, j)),   # W_in^T tile
                pl.BlockSpec((tn, d_model), lambda i, j: (j, 0)),   # W_out^T tile
                pl.BlockSpec((1, tn), lambda i, j: (0, j)),         # b_in tile
                pl.BlockSpec((1, d_model), lambda i, j: (0, 0)),    # b_out
            ],
            out_specs=pl.BlockSpec((tm, d_model), lambda i, j: (i, 0)),
            scratch_shapes=[pltpu.VMEM((tm, d_model), jnp.float32)],
        ),
        compiler_params=pltpu.CompilerParams(
            dimension_semantics=("parallel", "arbitrary"),
            vmem_limit_bytes=vmem_budget,
        ),
        cost_estimate=pl.CostEstimate(
            flops=int(flops),
            transcendentals=int(transcendentals),
            bytes_accessed=int(bytes_accessed),
        ),
    )(x2d, w_in_t, w_out_t, b_in2d, b_out2d)

    return out2d.reshape(B, P, d_model)


def mlp_reference(x, w_in, w_out, b_in, b_out, *, act_type="ReLU"):
    pre = jnp.einsum("md,bpd->bpm", w_in, x) + b_in
    if act_type == "ReLU":
        post = jax.nn.relu(pre)
    else:
        post = 0.5 * pre * (1.0 + jax.lax.erf(pre / jnp.sqrt(2.0)))
    return jnp.einsum("dm,bpm->bpd", w_out, post) + b_out


if __name__ == "__main__":
    # Small shapes consistent with the module: batch=2, pos=8, d_model=32,
    # d_mlp=128; mlp_bias=True.
    batch, pos, d_model, d_mlp = 2, 8, 32, 128

    key = jax.random.PRNGKey(0)
    kx, kwin, kwout, kbin, kbout = jax.random.split(key, 5)

    x = jax.random.normal(kx, (batch, pos, d_model), dtype=jnp.float32)
    # Same init scheme as the module: randn / sqrt(d_model); small random
    # biases so the bias-add paths are actually exercised numerically.
    w_in = jax.random.normal(kwin, (d_mlp, d_model), dtype=jnp.float32) / jnp.sqrt(d_model)
    w_out = jax.random.normal(kwout, (d_model, d_mlp), dtype=jnp.float32) / jnp.sqrt(d_model)
    b_in = 0.1 * jax.random.normal(kbin, (d_mlp,), dtype=jnp.float32)
    b_out = 0.1 * jax.random.normal(kbout, (d_model,), dtype=jnp.float32)

    ok = True
    for act_type in ("ReLU", "GeLU"):
        out = mlp_forward(x, w_in, w_out, b_in, b_out, act_type=act_type)
        out = jax.block_until_ready(out)
        ref = mlp_reference(x, w_in, w_out, b_in, b_out, act_type=act_type)
        ok = ok and out.shape == (batch, pos, d_model)
        # bf16 MXU operands with f32 accumulation -> compare at bf16 tolerance.
        ok = ok and bool(jnp.allclose(out, ref, atol=5e-2, rtol=5e-2))

    assert ok
    print("KERNEL_OK")
</pallas_src>

<mosaic_0001>
module attributes {stable_mosaic.version = 11 : i64} {
  func.func @_mlp_kernel(%arg0: i32, %arg1: i32, %arg2: memref<16x32xf32, #tpu.memory_space<vmem>>, %arg3: memref<32x128xbf16, #tpu.memory_space<vmem>>, %arg4: memref<128x32xbf16, #tpu.memory_space<vmem>>, %arg5: memref<1x128xf32, #tpu.memory_space<vmem>>, %arg6: memref<1x32xf32, #tpu.memory_space<vmem>>, %arg7: memref<16x32xf32, #tpu.memory_space<vmem>>, %arg8: memref<16x32xf32, #tpu.memory_space<vmem>>) attributes {dimension_semantics = [#tpu.dimension_semantics<parallel>, #tpu.dimension_semantics<arbitrary>], iteration_bounds = array<i64: 1, 1>, scalar_prefetch = 0 : i64, scratch_operands = 1 : i64, tpu.core_type = #tpu.core_type<tc>, window_params = [{transform_indices = @transform_0, window_bounds = array<i64: 16, 32>}, {transform_indices = @transform_1, window_bounds = array<i64: 32, 128>}, {transform_indices = @transform_2, window_bounds = array<i64: 128, 32>}, {transform_indices = @transform_3, window_bounds = array<i64: 1, 128>}, {pipeline_mode = #tpu.pipeline_mode<synchronous>, transform_indices = @transform_4, window_bounds = array<i64: 1, 32>}, {transform_indices = @transform_5, window_bounds = array<i64: 16, 32>}]} {
    %c0_i32 = arith.constant 0 : i32
    %0 = arith.cmpi eq, %arg1, %c0_i32 : i32
    %1 = arith.extui %0 : i1 to i32
    %c0_i32_0 = arith.constant 0 : i32
    %2 = arith.cmpi ne, %1, %c0_i32_0 : i32
    scf.if %2 {
      %cst_16 = arith.constant 0.000000e+00 : f32
      %21 = vector.broadcast %cst_16 : f32 to vector<16x32xf32>
      %c0_17 = arith.constant 0 : index
      %c0_18 = arith.constant 0 : index
      %22 = vector.load %arg8[%c0_17, %c0_18] : memref<16x32xf32, #tpu.memory_space<vmem>>, vector<16x32xf32>
      tpu.vector_store %arg8[%c0_17, %c0_18], %21 {strides = array<i32>} : memref<16x32xf32, #tpu.memory_space<vmem>>, vector<16x32xf32>,
    } else {
    }
    %c0 = arith.constant 0 : index
    %c0_1 = arith.constant 0 : index
    %3 = vector.load %arg2[%c0, %c0_1] : memref<16x32xf32, #tpu.memory_space<vmem>>, vector<16x32xf32>
    %4 = arith.truncf %3 : vector<16x32xf32> to vector<16x32xbf16>
    %c0_2 = arith.constant 0 : index
    %c0_3 = arith.constant 0 : index
    %5 = vector.load %arg3[%c0_2, %c0_3] : memref<32x128xbf16, #tpu.memory_space<vmem>>, vector<32x128xbf16>
    %cst = arith.constant dense<0.000000e+00> : vector<16x128xf32>
    %6 = tpu.matmul %4, %5, %cst {dimension_numbers = #tpu.dot_dimension_numbers<[1], [0], [0], [1], [0, 0, 1, 1], [], []>} : vector<16x32xbf16>, vector<32x128xbf16>, vector<16x128xf32> -> vector<16x128xf32>
    %c0_4 = arith.constant 0 : index
    %c0_5 = arith.constant 0 : index
    %7 = vector.load %arg5[%c0_4, %c0_5] : memref<1x128xf32, #tpu.memory_space<vmem>>, vector<1x128xf32>
    %8 = vector.broadcast %7 : vector<1x128xf32> to vector<16x128xf32>
    %9 = arith.addf %6, %8 : vector<16x128xf32>
    %cst_6 = arith.constant 0.000000e+00 : f32
    %10 = vector.broadcast %cst_6 : f32 to vector<16x128xf32>
    %11 = arith.maximumf %9, %10 : vector<16x128xf32>
    %c0_7 = arith.constant 0 : index
    %c0_8 = arith.constant 0 : index
    %12 = vector.load %arg8[%c0_7, %c0_8] : memref<16x32xf32, #tpu.memory_space<vmem>>, vector<16x32xf32>
    %13 = arith.truncf %11 : vector<16x128xf32> to vector<16x128xbf16>
    %c0_9 = arith.constant 0 : index
    %c0_10 = arith.constant 0 : index
    %14 = vector.load %arg4[%c0_9, %c0_10] : memref<128x32xbf16, #tpu.memory_space<vmem>>, vector<128x32xbf16>
    %cst_11 = arith.constant dense<0.000000e+00> : vector<16x32xf32>
    %15 = tpu.matmul %13, %14, %cst_11 {dimension_numbers = #tpu.dot_dimension_numbers<[1], [0], [0], [1], [0, 0, 1, 1], [], []>} : vector<16x128xbf16>, vector<128x32xbf16>, vector<16x32xf32> -> vector<16x32xf32>
    %16 = arith.addf %12, %15 : vector<16x32xf32>
    %c0_12 = arith.constant 0 : index
    %c0_13 = arith.constant 0 : index
    %17 = vector.load %arg8[%c0_12, %c0_13] : memref<16x32xf32, #tpu.memory_space<vmem>>, vector<16x32xf32>
    tpu.vector_store %arg8[%c0_12, %c0_13], %16 {strides = array<i32>} : memref<16x32xf32, #tpu.memory_space<vmem>>, vector<16x32xf32>,
    %c0_i32_14 = arith.constant 0 : i32
    %18 = arith.cmpi eq, %arg1, %c0_i32_14 : i32
    %19 = arith.extui %18 : i1 to i32
    %c0_i32_15 = arith.constant 0 : i32
    %20 = arith.cmpi ne, %19, %c0_i32_15 : i32
    scf.if %20 {
      %c0_16 = arith.constant 0 : index
      %c0_17 = arith.constant 0 : index
      %21 = vector.load %arg8[%c0_16, %c0_17] : memref<16x32xf32, #tpu.memory_space<vmem>>, vector<16x32xf32>
      %c0_18 = arith.constant 0 : index
      %c0_19 = arith.constant 0 : index
      %22 = vector.load %arg6[%c0_18, %c0_19] : memref<1x32xf32, #tpu.memory_space<vmem>>, vector<1x32xf32>
      %23 = vector.broadcast %22 : vector<1x32xf32> to vector<16x32xf32>
      %24 = arith.addf %21, %23 : vector<16x32xf32>
      %c0_20 = arith.constant 0 : index
      %c0_21 = arith.constant 0 : index
      %25 = vector.load %arg7[%c0_20, %c0_21] : memref<16x32xf32, #tpu.memory_space<vmem>>, vector<16x32xf32>
      tpu.vector_store %arg7[%c0_20, %c0_21], %24 {strides = array<i32>} : memref<16x32xf32, #tpu.memory_space<vmem>>, vector<16x32xf32>,
    } else {
    }
    return
  }
  func.func @transform_0(%arg0: i32, %arg1: i32) -> (i32, i32) {
    %c0_i32 = arith.constant 0 : i32
    %c0_i32_0 = arith.constant 0 : i32
    return %arg0, %c0_i32 : i32, i32
  }
  func.func @transform_1(%arg0: i32, %arg1: i32) -> (i32, i32) {
    %c0_i32 = arith.constant 0 : i32
    %c0_i32_0 = arith.constant 0 : i32
    return %c0_i32, %arg1 : i32, i32
  }
  func.func @transform_2(%arg0: i32, %arg1: i32) -> (i32, i32) {
    %c0_i32 = arith.constant 0 : i32
    %c0_i32_0 = arith.constant 0 : i32
    return %arg1, %c0_i32 : i32, i32
  }
  func.func @transform_3(%arg0: i32, %arg1: i32) -> (i32, i32) {
    %c0_i32 = arith.constant 0 : i32
    %c0_i32_0 = arith.constant 0 : i32
    return %c0_i32, %arg1 : i32, i32
  }
  func.func @transform_4(%arg0: i32, %arg1: i32) -> (i32, i32) {
    %c0_i32 = arith.constant 0 : i32
    %c0_i32_0 = arith.constant 0 : i32
    %c0_i32_1 = arith.constant 0 : i32
    return %c0_i32, %c0_i32_0 : i32, i32
  }
  func.func @transform_5(%arg0: i32, %arg1: i32) -> (i32, i32) {
    %c0_i32 = arith.constant 0 : i32
    %c0_i32_0 = arith.constant 0 : i32
    return %arg0, %c0_i32 : i32, i32
  }
}

</mosaic_0001>

<bundles_post_ra>
// kernel: tpu_custom_call.1
= control target key start
LH: loop header
LB: loop body
LE: loop exit
PB: predicated region body
PF: predicated region fallthrough
CT: control target
= control target key end

     0   :  { %s357_s0 = inlined_call_operand.vmem [shape: f32[16,32], index: 0, kind: input, shape index: {}]   ;;  %s358_s1 = inlined_call_operand.vmem [shape: bf16[32,128], index: 1, kind: input, shape index: {}]   ;;  %s359_s2 = inlined_call_operand.vmem [shape: bf16[128,32], index: 2, kind: input, shape index: {}]   ;;  %s360_s3 = inlined_call_operand.vmem [shape: f32[1,128], index: 3, kind: input, shape index: {}]   ;;  %s361_s4 = inlined_call_operand.vmem [shape: f32[1,32], index: 4, kind: input, shape index: {}]   ;;  %s362_s5 = inlined_call_operand.hbm [shape: f32[16,32], index: 5, kind: output, shape index: {}]  }
   0x1   :  { %v230_v0 = vld [vmem:[%s358_s1 + $0x8] sm:$0xff]  ;;  %v229_v1 = vld [vmem:[%s358_s1] sm:$0xff]  ;;  %v238_v2 = vld [vmem:[%s359_s2 + $0x38] sm:$0xff] }
   0x2   :  { %62 = vmatpush.bf16.msra.mxu0 %v230_v0  ;;  %v29_v3 = vld [vmem:[%s357_s0] sm:$0xff]  ;;  %v30_v4 = vld [vmem:[%s357_s0 + $0x8] sm:$0xff]  ;;  %139 = vmatpush.bf16.msra.mxu1 %v238_v2  ;;  %v237_v5 = vld [vmem:[%s359_s2 + $0x30] sm:$0xff] }
   0x3   :  { %10 = vsyncpa [#allocation4], 0  ;;  %v31_v6 = vpack.c.bf16 %v30_v4, %v29_v3  ;;  %vm26_vm0 = vcmask 261120   ;;  %v236_v7 = vld [vmem:[%s359_s2 + $0x28] sm:$0xff]  ;;  %v235_v8 = vld [vmem:[%s359_s2 + $0x20] sm:$0xff]  ;;  %v271_v13 = vmov 0.0  }
   0x4   :  { %v234_v9 = vld [vmem:[%s359_s2 + $0x18] sm:$0xff]  ;;  %v233_v10 = vld [vmem:[%s359_s2 + $0x10] sm:$0xff]  ;;  %v232_v11 = vld [vmem:[%s359_s2 + $0x8] sm:$0xff]  ;;  %27 = vst.msk [vmem:[#allocation2] sm:$0xff] %vm26_vm0, %v271_v13  ;;  %s176_s21 = sshll.u32 %s362_s5, 4  ;;  %s274_s22 = smov 8   ;;  %s177_s21 = int_to_ptr.hbm [resolvable:$true] %s176_s21 }
   0x5   :  { %v231_v12 = vld [vmem:[%s359_s2] sm:$0xff]  ;;  %28 = vst.msk [vmem:[#allocation2 + $0x8] sm:$0xff] %vm26_vm0, %v271_v13 }
   0x6   :  { %63 = vmatpush.bf16.msra.mxu0 %v229_v1  ;;  %140 = vmatpush.bf16.msra.mxu1 %v237_v5  ;;  %v243_v15 = vld [vmem:[%s360_s3] ss:$0 sm:$0xff]  ;;  %s272_s3 = smov [#allocation3]  }
   0x7   :  { %v244_v26 = vld [vmem:[%s361_s4] ss:$0 sm:$0xff]  ;;  %s174_s18 = sshll.u32 %s272_s3, 4  ;;  %s273_s4 = smov 128   ;;  %s175_s18 = int_to_ptr.vmem [resolvable:$true] %s174_s18 }
   0x9   :  { %196 = vmatmul.msk.bf16.vlgmr.msra.gmra.mxu0 %vm26_vm0, %v31_v6 }
   0xa   :  { %141 = vmatpush.bf16.msra.mxu1 %v236_v7 }
   0xb   :  { %v72_v22 = vld [vmem:[#allocation2] sm:$0xff] }
   0xc   :  { %v73_v25 = vld [vmem:[#allocation2 + $0x8] sm:$0xff] }
   0xe   :  { %142 = vmatpush.bf16.msra.mxu1 %v235_v8 }
  0x12   :  { %143 = vmatpush.bf16.msra.mxu1 %v234_v9 }
  0x16   :  { %144 = vmatpush.bf16.msra.mxu1 %v233_v10 }
  0x1a   :  { %145 = vmatpush.bf16.msra.mxu1 %v232_v11 }
  0x1e   :  { %146 = vmatpush.bf16.msra.mxu1 %v231_v12 }
  0x86   :  { %v65_v14 = vpop.f32.mrf.mxu0 }
  0x87   :  { %v66_v16 = vadd.f32 %v243_v15, %v65_v14 }
  0x89   :  { %v70_v19 = vmax.f32 %v66_v16, 0.0 }
  0x8e   :  { %v67_v17 = vpop.f32.mrf.mxu0 }
  0x8f   :  { %v68_v18 = vadd.f32 %v243_v15, %v67_v17 }
  0x91   :  { %v71_v20 = vmax.f32 %v68_v18, 0.0 }
  0x93   :  { %v74_v21 = vpack.c.bf16 %v71_v20, %v70_v19 }
  0x95   :  { %147 = vmatmul.bf16.vlgmr.msra.gmra.mxu1 %v74_v21 }
 0x112   :  { %v148_v23 = vpop.f32.mrf.mxu1 }
 0x113   :  { %v153_v24 = vadd.f32 %v148_v23, %v72_v22 }
 0x115   :  { %155 = vst.msk [vmem:[#allocation2] sm:$0xff] %vm26_vm0, %v153_v24 }
 0x11a   :  { %v150_v27 = vpop.f32.mrf.mxu1 }
 0x11b   :  { %v154_v28 = vadd.f32 %v150_v27, %v73_v25 }
 0x11c   :  { %v160_v29 = vld [vmem:[#allocation2] sm:$0xff] }
 0x11d   :  { %156 = vst.msk [vmem:[#allocation2 + $0x8] sm:$0xff] %vm26_vm0, %v154_v28  ;;  %v166_v30 = vadd.f32 %v244_v26, %v160_v29 }
 0x11f   :  { %168 = vst.msk [vmem:[#allocation3] sm:$0xff] %vm26_vm0, %v166_v30 }
 0x124   :  { %v161_v31 = vld [vmem:[#allocation2 + $0x8] sm:$0xff] }
 0x125   :  { %v167_v32 = vadd.f32 %v244_v26, %v161_v31 }
 0x127   :  { %169 = vst.msk [vmem:[#allocation3 + $0x8] sm:$0xff] %vm26_vm0, %v167_v32 }
 0x128   :  { %182 = dma.vmem_to_hbm [thread:$0]  %s175_s18, 256, %s177_s21, [#allocation4], %s273_s4, %s273_s4, %s274_s22  }
 0x129   :  { %269 = dma.done.wait [#allocation4], 256  }
 0x12a   :  { %270 = vsyncadd [#allocation4], 4294967040 }
 0x12b   :  { %187 = vsyncpa [#allocation4], 1 }

</bundles_post_ra>
